<compile_context>
chip_gen: v7x
topology: tpu7x:2x2x1
jax: 0.10.0
libtpu: 0.0.40
codegen_flags: <defaults>
</compile_context>

<pallas_src>
import functools

import jax
import jax.numpy as jnp
from jax.experimental import pallas as pl
from jax.experimental.pallas import tpu as pltpu

LANE = 128     # vreg lane width
SUBLANE = 8    # f32 sublane width: batch-tile granularity


def _round_up(x: int, m: int) -> int:
    return ((x + m - 1) // m) * m


# --------------------------------------------------------------------------- #
# Kernel
# --------------------------------------------------------------------------- #
def _mlp_fused_kernel(*refs, num_layers: int, compute_dtype):
    """Fused MLP over one batch tile.

    refs = (x_ref, w0_ref, b0_ref, ..., w{L-1}_ref, b{L-1}_ref, o_ref)
      x_ref : [TILE_B, F0]        VMEM
      wi_ref: [Fi, Fi+1]          VMEM (pre-transposed, compute_dtype, resident)
      bi_ref: [1, Fi+1]           VMEM (f32, resident)
      o_ref : [TILE_B, F_out]     VMEM
    """
    x_ref = refs[0]
    o_ref = refs[-1]

    h = x_ref[...]                      # loaded once; cast fuses into first matmul operand
    for i in range(num_layers):
        w_ref = refs[1 + 2 * i]
        b_ref = refs[2 + 2 * i]
        # MXU matmul: compute_dtype operands (bf16 on v6e/v7x), f32 accumulation.
        y = jnp.dot(h.astype(compute_dtype), w_ref[...],
                    preferred_element_type=jnp.float32)
        # f32 epilogue (VPU add + EUP tanh); v5e has no bf16 VPU/EUP path.
        h = y + b_ref[...]
        if i < num_layers - 1:
            h = jnp.tanh(h)
    o_ref[...] = h.astype(o_ref.dtype)


# --------------------------------------------------------------------------- #
# One-time parameter prep (hoisted out of the per-call path; call once & reuse)
# --------------------------------------------------------------------------- #
def prepare_params(params, compute_dtype=jnp.bfloat16):
    """params[i] = (w_t [in, out], b [1, out]).  Returns a cached, kernel-ready pytree.

    * Weights cast to compute_dtype once (bf16 halves weight HBM traffic and
      resident VMEM on v6e/v7x); biases kept f32 for the f32 epilogue.
    * Feature dims are NOT lane-padded (full-array weight blocks are legal for
      any shape).  Only a wide, lane-misaligned FINAL output dim is padded so
      the HBM store stays lane-dense; tiny outputs are stored at true width.
    """
    out_features = int(params[-1][0].shape[1])
    out_store = out_features
    if out_features > LANE and out_features % LANE != 0:
        out_store = _round_up(out_features, LANE)

    layers = []
    last = len(params) - 1
    for li, (w_t, b) in enumerate(params):
        w = jnp.asarray(w_t)
        bb = jnp.asarray(b, dtype=jnp.float32).reshape(1, -1)
        if li == last and out_store != out_features:
            w = jnp.pad(w, ((0, 0), (0, out_store - out_features)))
            bb = jnp.pad(bb, ((0, 0), (0, out_store - out_features)))
        layers.append((w.astype(compute_dtype), bb))

    return {
        "layers": layers,
        "in_features": int(params[0][0].shape[0]),
        "out_features": out_features,
        "out_store": out_store,
        "compute_dtype": compute_dtype,
    }


def _choose_batch_tiling(batch: int):
    """~512-row tiles (85% of HBM roofline vs 63% at 256), >=2 grid steps so both
    v7x TensorCores get work, and minimal last-tile batch padding."""
    num_tiles = max(pl.cdiv(batch, 512), 2)
    tile_b = _round_up(pl.cdiv(batch, num_tiles), SUBLANE)
    batch_pad = _round_up(batch, tile_b)
    if batch_pad // tile_b < 2:          # keep 2 parallel steps for v7x's 2 TCs
        batch_pad = 2 * tile_b
    return tile_b, batch_pad


# --------------------------------------------------------------------------- #
# Forward wrapper
# --------------------------------------------------------------------------- #
def mlp_forward(prepared, x, *, tile_b=None):
    layers = prepared["layers"]
    num_layers = len(layers)
    in_features = prepared["in_features"]
    out_features = prepared["out_features"]
    out_store = prepared["out_store"]
    compute_dtype = prepared["compute_dtype"]

    batch, xf = x.shape
    assert xf == in_features, "input feature width does not match the MLP"

    if tile_b is None:
        tile_b, batch_pad = _choose_batch_tiling(batch)
    else:
        tile_b = _round_up(tile_b, SUBLANE)
        batch_pad = _round_up(batch, tile_b)
    x_p = jnp.pad(x, ((0, batch_pad - batch), (0, 0))) if batch_pad != batch else x
    grid = (batch_pad // tile_b,)

    flat_inputs = [x_p]
    for w, b in layers:
        flat_inputs.extend([w, b])

    # ---- VMEM budget: resident weights + double-buffered x/out tiles + live h ----
    itemsize = x.dtype.itemsize
    w_bytes = sum(w.size * w.dtype.itemsize + b.size * b.dtype.itemsize
                  for w, b in layers)
    io_bytes = 2 * tile_b * in_features * itemsize + 2 * tile_b * out_store * itemsize
    widest = max(max(w.shape) for w, _ in layers)
    act_bytes = 2 * tile_b * widest * (4 + jnp.dtype(compute_dtype).itemsize)

    def _needed(weight_buffers):
        return weight_buffers * w_bytes + io_bytes + act_bytes

    # v7x has only 64 MiB physical VMEM per TensorCore; keep headroom.
    if _needed(1) > (56 << 20):
        # TODO(synk): tile oversized layers over N (and K with an f32 accumulator
        # scratch + an extra "arbitrary" grid axis) instead of keeping them resident.
        raise NotImplementedError("resident MLP weights exceed the per-core VMEM budget")

    kernel = functools.partial(_mlp_fused_kernel,
                               num_layers=num_layers,
                               compute_dtype=compute_dtype)

    cost = pl.CostEstimate(
        flops=2 * batch_pad * sum(w.shape[0] * w.shape[1] for w, _ in layers),
        transcendentals=batch_pad * sum(w.shape[1] for w, _ in layers[:-1]),
        bytes_accessed=int(x_p.size * itemsize + w_bytes
                           + batch_pad * out_store * itemsize),
    )

    def _build(single_buffer_weights: bool):
        in_specs = [pl.BlockSpec((tile_b, in_features), lambda i: (i, 0))]
        for w, b in layers:
            if single_buffer_weights:
                # Constant index map -> DMA'd once; a single buffer halves
                # resident weight VMEM (matters most on v7x's 64 MiB).
                wspec = pl.BlockSpec(w.shape, lambda i: (0, 0),
                                     pipeline_mode=pl.Buffered(1))
                bspec = pl.BlockSpec(b.shape, lambda i: (0, 0),
                                     pipeline_mode=pl.Buffered(1))
            else:
                wspec = pl.BlockSpec(w.shape, lambda i: (0, 0))
                bspec = pl.BlockSpec(b.shape, lambda i: (0, 0))
            in_specs.extend([wspec, bspec])

        wbuf = 1 if single_buffer_weights else 2
        # Explicit limit: raises v5e's 16 MiB scoped default, stays <= 64 MiB (v7x).
        vmem_limit = int(min(max(2 * _needed(wbuf), 32 << 20), 64 << 20))

        return pl.pallas_call(
            kernel,
            out_shape=jax.ShapeDtypeStruct((batch_pad, out_store), x.dtype),
            grid=grid,
            in_specs=in_specs,
            out_specs=pl.BlockSpec((tile_b, out_store), lambda i: (i, 0)),
            compiler_params=pltpu.CompilerParams(
                dimension_semantics=("parallel",),
                vmem_limit_bytes=vmem_limit,
            ),
            cost_estimate=cost,
        )

    try:
        out_padded = _build(True)(*flat_inputs)
        jax.block_until_ready(out_padded)   # force compile so the fallback can trigger
    except Exception:
        # Fallback: default double-buffered resident weights.
        out_padded = _build(False)(*flat_inputs)

    # Slice away batch padding and (if any) final-output lane padding.
    return out_padded[:batch, :out_features]


# --------------------------------------------------------------------------- #
# Init + pure-JAX reference (torch MLP.forward semantics)
# --------------------------------------------------------------------------- #
def init_mlp_params(key, sizes, bias=True, dtype=jnp.float32):
    """Mimics PyTorch nn.Linear default init: U(-1/sqrt(in), 1/sqrt(in))."""
    params = []
    for i in range(len(sizes) - 1):
        fan_in, fan_out = sizes[i], sizes[i + 1]
        key, kw, kb = jax.random.split(key, 3)
        bound = 1.0 / jnp.sqrt(jnp.float32(fan_in))
        # Stored already transposed: [in, out] so the kernel computes x @ W + b.
        w_t = jax.random.uniform(kw, (fan_in, fan_out), dtype, -bound, bound)
        if bias:
            b = jax.random.uniform(kb, (1, fan_out), dtype, -bound, bound)
        else:
            b = jnp.zeros((1, fan_out), dtype)
        params.append((w_t, b))
    return params


def mlp_reference(params, x):
    n_layers = len(params)
    h = x
    for i, (w_t, b) in enumerate(params):
        h = h @ w_t + b
        if i < n_layers - 1:
            h = jnp.tanh(h)
    return h


if __name__ == "__main__":
    key = jax.random.PRNGKey(0)
    # MLP(sizes): Linear(32->64) Tanh Linear(64->48) Tanh Linear(48->16)
    sizes = (32, 64, 48, 16)
    batch = 8

    kx, kp = jax.random.split(key)
    x = jax.random.normal(kx, (batch, sizes[0]), jnp.float32)
    params = init_mlp_params(kp, sizes, bias=True)

    ref = jax.block_until_ready(mlp_reference(params, x))

    # Exact path: f32 MXU operands (validation; matches reference at 1e-5).
    prep_f32 = prepare_params(params, compute_dtype=jnp.float32)
    out_f32 = jax.block_until_ready(mlp_forward(prep_f32, x))
    assert out_f32.shape == (batch, sizes[-1])
    assert jnp.allclose(out_f32, ref, atol=1e-5, rtol=1e-5)

    # Default throughput path: bf16 MXU operands / bf16 resident weights,
    # f32 accumulation + f32 bias/tanh epilogue (v5e-friendly).
    prep_bf16 = prepare_params(params)   # compute_dtype=jnp.bfloat16
    out_bf16 = jax.block_until_ready(mlp_forward(prep_bf16, x))
    assert out_bf16.shape == (batch, sizes[-1])
    assert jnp.allclose(out_bf16, ref, atol=3e-2, rtol=3e-2)

    print("KERNEL_OK")
</pallas_src>

<mosaic_0001>
module attributes {stable_mosaic.version = 11 : i64} {
  func.func @_mlp_fused_kernel(%arg0: i32, %arg1: memref<8x32xf32, #tpu.memory_space<vmem>>, %arg2: memref<32x64xf32, #tpu.memory_space<vmem>>, %arg3: memref<1x64xf32, #tpu.memory_space<vmem>>, %arg4: memref<64x48xf32, #tpu.memory_space<vmem>>, %arg5: memref<1x48xf32, #tpu.memory_space<vmem>>, %arg6: memref<48x16xf32, #tpu.memory_space<vmem>>, %arg7: memref<1x16xf32, #tpu.memory_space<vmem>>, %arg8: memref<8x16xf32, #tpu.memory_space<vmem>>) attributes {dimension_semantics = [#tpu.dimension_semantics<parallel>], iteration_bounds = array<i64: 2>, scalar_prefetch = 0 : i64, scratch_operands = 0 : i64, tpu.core_type = #tpu.core_type<tc>, window_params = [{transform_indices = @transform_0, window_bounds = array<i64: 8, 32>}, {pipeline_mode = #tpu.pipeline_mode<synchronous>, transform_indices = @transform_1, window_bounds = array<i64: 32, 64>}, {pipeline_mode = #tpu.pipeline_mode<synchronous>, transform_indices = @transform_2, window_bounds = array<i64: 1, 64>}, {pipeline_mode = #tpu.pipeline_mode<synchronous>, transform_indices = @transform_3, window_bounds = array<i64: 64, 48>}, {pipeline_mode = #tpu.pipeline_mode<synchronous>, transform_indices = @transform_4, window_bounds = array<i64: 1, 48>}, {pipeline_mode = #tpu.pipeline_mode<synchronous>, transform_indices = @transform_5, window_bounds = array<i64: 48, 16>}, {pipeline_mode = #tpu.pipeline_mode<synchronous>, transform_indices = @transform_6, window_bounds = array<i64: 1, 16>}, {transform_indices = @transform_7, window_bounds = array<i64: 8, 16>}]} {
    %c0 = arith.constant 0 : index
    %c0_0 = arith.constant 0 : index
    %0 = vector.load %arg1[%c0, %c0_0] : memref<8x32xf32, #tpu.memory_space<vmem>>, vector<8x32xf32>
    %c0_1 = arith.constant 0 : index
    %c0_2 = arith.constant 0 : index
    %1 = vector.load %arg2[%c0_1, %c0_2] : memref<32x64xf32, #tpu.memory_space<vmem>>, vector<32x64xf32>
    %cst = arith.constant dense<0.000000e+00> : vector<8x64xf32>
    %2 = tpu.matmul %0, %1, %cst {dimension_numbers = #tpu.dot_dimension_numbers<[1], [0], [0], [1], [0, 0, 1, 1], [], []>} : vector<8x32xf32>, vector<32x64xf32>, vector<8x64xf32> -> vector<8x64xf32>
    %c0_3 = arith.constant 0 : index
    %c0_4 = arith.constant 0 : index
    %3 = vector.load %arg3[%c0_3, %c0_4] : memref<1x64xf32, #tpu.memory_space<vmem>>, vector<1x64xf32>
    %4 = vector.broadcast %3 : vector<1x64xf32> to vector<8x64xf32>
    %5 = arith.addf %2, %4 : vector<8x64xf32>
    %6 = math.tanh %5 : vector<8x64xf32>
    %c0_5 = arith.constant 0 : index
    %c0_6 = arith.constant 0 : index
    %7 = vector.load %arg4[%c0_5, %c0_6] : memref<64x48xf32, #tpu.memory_space<vmem>>, vector<64x48xf32>
    %cst_7 = arith.constant dense<0.000000e+00> : vector<8x48xf32>
    %8 = tpu.matmul %6, %7, %cst_7 {dimension_numbers = #tpu.dot_dimension_numbers<[1], [0], [0], [1], [0, 0, 1, 1], [], []>} : vector<8x64xf32>, vector<64x48xf32>, vector<8x48xf32> -> vector<8x48xf32>
    %c0_8 = arith.constant 0 : index
    %c0_9 = arith.constant 0 : index
    %9 = vector.load %arg5[%c0_8, %c0_9] : memref<1x48xf32, #tpu.memory_space<vmem>>, vector<1x48xf32>
    %10 = vector.broadcast %9 : vector<1x48xf32> to vector<8x48xf32>
    %11 = arith.addf %8, %10 : vector<8x48xf32>
    %12 = math.tanh %11 : vector<8x48xf32>
    %c0_10 = arith.constant 0 : index
    %c0_11 = arith.constant 0 : index
    %13 = vector.load %arg6[%c0_10, %c0_11] : memref<48x16xf32, #tpu.memory_space<vmem>>, vector<48x16xf32>
    %cst_12 = arith.constant dense<0.000000e+00> : vector<8x16xf32>
    %14 = tpu.matmul %12, %13, %cst_12 {dimension_numbers = #tpu.dot_dimension_numbers<[1], [0], [0], [1], [0, 0, 1, 1], [], []>} : vector<8x48xf32>, vector<48x16xf32>, vector<8x16xf32> -> vector<8x16xf32>
    %c0_13 = arith.constant 0 : index
    %c0_14 = arith.constant 0 : index
    %15 = vector.load %arg7[%c0_13, %c0_14] : memref<1x16xf32, #tpu.memory_space<vmem>>, vector<1x16xf32>
    %16 = vector.broadcast %15 : vector<1x16xf32> to vector<8x16xf32>
    %17 = arith.addf %14, %16 : vector<8x16xf32>
    %c0_15 = arith.constant 0 : index
    %c0_16 = arith.constant 0 : index
    %18 = vector.load %arg8[%c0_15, %c0_16] : memref<8x16xf32, #tpu.memory_space<vmem>>, vector<8x16xf32>
    tpu.vector_store %arg8[%c0_15, %c0_16], %17 {strides = array<i32>} : memref<8x16xf32, #tpu.memory_space<vmem>>, vector<8x16xf32>,
    return
  }
  func.func @transform_0(%arg0: i32) -> (i32, i32) {
    %c0_i32 = arith.constant 0 : i32
    %c0_i32_0 = arith.constant 0 : i32
    return %arg0, %c0_i32 : i32, i32
  }
  func.func @transform_1(%arg0: i32) -> (i32, i32) {
    %c0_i32 = arith.constant 0 : i32
    %c0_i32_0 = arith.constant 0 : i32
    %c0_i32_1 = arith.constant 0 : i32
    return %c0_i32, %c0_i32_0 : i32, i32
  }
  func.func @transform_2(%arg0: i32) -> (i32, i32) {
    %c0_i32 = arith.constant 0 : i32
    %c0_i32_0 = arith.constant 0 : i32
    %c0_i32_1 = arith.constant 0 : i32
    return %c0_i32, %c0_i32_0 : i32, i32
  }
  func.func @transform_3(%arg0: i32) -> (i32, i32) {
    %c0_i32 = arith.constant 0 : i32
    %c0_i32_0 = arith.constant 0 : i32
    %c0_i32_1 = arith.constant 0 : i32
    return %c0_i32, %c0_i32_0 : i32, i32
  }
  func.func @transform_4(%arg0: i32) -> (i32, i32) {
    %c0_i32 = arith.constant 0 : i32
    %c0_i32_0 = arith.constant 0 : i32
    %c0_i32_1 = arith.constant 0 : i32
    return %c0_i32, %c0_i32_0 : i32, i32
  }
  func.func @transform_5(%arg0: i32) -> (i32, i32) {
    %c0_i32 = arith.constant 0 : i32
    %c0_i32_0 = arith.constant 0 : i32
    %c0_i32_1 = arith.constant 0 : i32
    return %c0_i32, %c0_i32_0 : i32, i32
  }
  func.func @transform_6(%arg0: i32) -> (i32, i32) {
    %c0_i32 = arith.constant 0 : i32
    %c0_i32_0 = arith.constant 0 : i32
    %c0_i32_1 = arith.constant 0 : i32
    return %c0_i32, %c0_i32_0 : i32, i32
  }
  func.func @transform_7(%arg0: i32) -> (i32, i32) {
    %c0_i32 = arith.constant 0 : i32
    %c0_i32_0 = arith.constant 0 : i32
    return %arg0, %c0_i32 : i32, i32
  }
}

module attributes {stable_mosaic.version = 11 : i64} {
  func.func @_mlp_fused_kernel(%arg0: i32, %arg1: memref<8x32xf32, #tpu.memory_space<vmem>>, %arg2: memref<32x64xf32, #tpu.memory_space<vmem>>, %arg3: memref<1x64xf32, #tpu.memory_space<vmem>>, %arg4: memref<64x48xf32, #tpu.memory_space<vmem>>, %arg5: memref<1x48xf32, #tpu.memory_space<vmem>>, %arg6: memref<48x16xf32, #tpu.memory_space<vmem>>, %arg7: memref<1x16xf32, #tpu.memory_space<vmem>>, %arg8: memref<8x16xf32, #tpu.memory_space<vmem>>) attributes {dimension_semantics = [#tpu.dimension_semantics<parallel>], iteration_bounds = array<i64: 2>, scalar_prefetch = 0 : i64, scratch_operands = 0 : i64, tpu.core_type = #tpu.core_type<tc>, window_params = [{transform_indices = @transform_0, window_bounds = array<i64: 8, 32>}, {pipeline_mode = #tpu.pipeline_mode<synchronous>, transform_indices = @transform_1, window_bounds = array<i64: 32, 64>}, {pipeline_mode = #tpu.pipeline_mode<synchronous>, transform_indices = @transform_2, window_bounds = array<i64: 1, 64>}, {pipeline_mode = #tpu.pipeline_mode<synchronous>, transform_indices = @transform_3, window_bounds = array<i64: 64, 48>}, {pipeline_mode = #tpu.pipeline_mode<synchronous>, transform_indices = @transform_4, window_bounds = array<i64: 1, 48>}, {pipeline_mode = #tpu.pipeline_mode<synchronous>, transform_indices = @transform_5, window_bounds = array<i64: 48, 16>}, {pipeline_mode = #tpu.pipeline_mode<synchronous>, transform_indices = @transform_6, window_bounds = array<i64: 1, 16>}, {transform_indices = @transform_7, window_bounds = array<i64: 8, 16>}]} {
    %c0 = arith.constant 0 : index
    %c0_0 = arith.constant 0 : index
    %0 = vector.load %arg1[%c0, %c0_0] : memref<8x32xf32, #tpu.memory_space<vmem>>, vector<8x32xf32>
    %c0_1 = arith.constant 0 : index
    %c0_2 = arith.constant 0 : index
    %1 = vector.load %arg2[%c0_1, %c0_2] : memref<32x64xf32, #tpu.memory_space<vmem>>, vector<32x64xf32>
    %cst = arith.constant dense<0.000000e+00> : vector<8x64xf32>
    %2 = tpu.matmul %0, %1, %cst {dimension_numbers = #tpu.dot_dimension_numbers<[1], [0], [0], [1], [0, 0, 1, 1], [], []>} : vector<8x32xf32>, vector<32x64xf32>, vector<8x64xf32> -> vector<8x64xf32>
    %c0_3 = arith.constant 0 : index
    %c0_4 = arith.constant 0 : index
    %3 = vector.load %arg3[%c0_3, %c0_4] : memref<1x64xf32, #tpu.memory_space<vmem>>, vector<1x64xf32>
    %4 = vector.broadcast %3 : vector<1x64xf32> to vector<8x64xf32>
    %5 = arith.addf %2, %4 : vector<8x64xf32>
    %6 = math.tanh %5 : vector<8x64xf32>
    %c0_5 = arith.constant 0 : index
    %c0_6 = arith.constant 0 : index
    %7 = vector.load %arg4[%c0_5, %c0_6] : memref<64x48xf32, #tpu.memory_space<vmem>>, vector<64x48xf32>
    %cst_7 = arith.constant dense<0.000000e+00> : vector<8x48xf32>
    %8 = tpu.matmul %6, %7, %cst_7 {dimension_numbers = #tpu.dot_dimension_numbers<[1], [0], [0], [1], [0, 0, 1, 1], [], []>} : vector<8x64xf32>, vector<64x48xf32>, vector<8x48xf32> -> vector<8x48xf32>
    %c0_8 = arith.constant 0 : index
    %c0_9 = arith.constant 0 : index
    %9 = vector.load %arg5[%c0_8, %c0_9] : memref<1x48xf32, #tpu.memory_space<vmem>>, vector<1x48xf32>
    %10 = vector.broadcast %9 : vector<1x48xf32> to vector<8x48xf32>
    %11 = arith.addf %8, %10 : vector<8x48xf32>
    %12 = math.tanh %11 : vector<8x48xf32>
    %c0_10 = arith.constant 0 : index
    %c0_11 = arith.constant 0 : index
    %13 = vector.load %arg6[%c0_10, %c0_11] : memref<48x16xf32, #tpu.memory_space<vmem>>, vector<48x16xf32>
    %cst_12 = arith.constant dense<0.000000e+00> : vector<8x16xf32>
    %14 = tpu.matmul %12, %13, %cst_12 {dimension_numbers = #tpu.dot_dimension_numbers<[1], [0], [0], [1], [0, 0, 1, 1], [], []>} : vector<8x48xf32>, vector<48x16xf32>, vector<8x16xf32> -> vector<8x16xf32>
    %c0_13 = arith.constant 0 : index
    %c0_14 = arith.constant 0 : index
    %15 = vector.load %arg7[%c0_13, %c0_14] : memref<1x16xf32, #tpu.memory_space<vmem>>, vector<1x16xf32>
    %16 = vector.broadcast %15 : vector<1x16xf32> to vector<8x16xf32>
    %17 = arith.addf %14, %16 : vector<8x16xf32>
    %c0_15 = arith.constant 0 : index
    %c0_16 = arith.constant 0 : index
    %18 = vector.load %arg8[%c0_15, %c0_16] : memref<8x16xf32, #tpu.memory_space<vmem>>, vector<8x16xf32>
    tpu.vector_store %arg8[%c0_15, %c0_16], %17 {strides = array<i32>} : memref<8x16xf32, #tpu.memory_space<vmem>>, vector<8x16xf32>,
    return
  }
  func.func @transform_0(%arg0: i32) -> (i32, i32) {
    %c0_i32 = arith.constant 0 : i32
    %c0_i32_0 = arith.constant 0 : i32
    return %arg0, %c0_i32 : i32, i32
  }
  func.func @transform_1(%arg0: i32) -> (i32, i32) {
    %c0_i32 = arith.constant 0 : i32
    %c0_i32_0 = arith.constant 0 : i32
    %c0_i32_1 = arith.constant 0 : i32
    return %c0_i32, %c0_i32_0 : i32, i32
  }
  func.func @transform_2(%arg0: i32) -> (i32, i32) {
    %c0_i32 = arith.constant 0 : i32
    %c0_i32_0 = arith.constant 0 : i32
    %c0_i32_1 = arith.constant 0 : i32
    return %c0_i32, %c0_i32_0 : i32, i32
  }
  func.func @transform_3(%arg0: i32) -> (i32, i32) {
    %c0_i32 = arith.constant 0 : i32
    %c0_i32_0 = arith.constant 0 : i32
    %c0_i32_1 = arith.constant 0 : i32
    return %c0_i32, %c0_i32_0 : i32, i32
  }
  func.func @transform_4(%arg0: i32) -> (i32, i32) {
    %c0_i32 = arith.constant 0 : i32
    %c0_i32_0 = arith.constant 0 : i32
    %c0_i32_1 = arith.constant 0 : i32
    return %c0_i32, %c0_i32_0 : i32, i32
  }
  func.func @transform_5(%arg0: i32) -> (i32, i32) {
    %c0_i32 = arith.constant 0 : i32
    %c0_i32_0 = arith.constant 0 : i32
    %c0_i32_1 = arith.constant 0 : i32
    return %c0_i32, %c0_i32_0 : i32, i32
  }
  func.func @transform_6(%arg0: i32) -> (i32, i32) {
    %c0_i32 = arith.constant 0 : i32
    %c0_i32_0 = arith.constant 0 : i32
    %c0_i32_1 = arith.constant 0 : i32
    return %c0_i32, %c0_i32_0 : i32, i32
  }
  func.func @transform_7(%arg0: i32) -> (i32, i32) {
    %c0_i32 = arith.constant 0 : i32
    %c0_i32_0 = arith.constant 0 : i32
    return %arg0, %c0_i32 : i32, i32
  }
}

</mosaic_0001>

<bundles_post_ra>
// kernel: tpu_custom_call.1
= control target key start
LH: loop header
LB: loop body
LE: loop exit
PB: predicated region body
PF: predicated region fallthrough
CT: control target
= control target key end

     0   :  { %12 = vsyncpa [#allocation3], 0  ;;  %s1042_s0 = inlined_call_operand.vmem [shape: f32[16,32], index: 0, kind: input, shape index: {}]   ;;  %s1043_s1 = inlined_call_operand.vmem [shape: f32[32,64], index: 1, kind: input, shape index: {}]   ;;  %s1044_s2 = inlined_call_operand.vmem [shape: f32[1,64], index: 2, kind: input, shape index: {}]   ;;  %s1045_s3 = inlined_call_operand.vmem [shape: f32[64,48], index: 3, kind: input, shape index: {}]   ;;  %s1046_s4 = inlined_call_operand.vmem [shape: f32[1,48], index: 4, kind: input, shape index: {}]   ;;  %s1047_s5 = inlined_call_operand.vmem [shape: f32[48,16], index: 5, kind: input, shape index: {}]   ;;  %s1048_s6 = inlined_call_operand.vmem [shape: f32[1,16], index: 6, kind: input, shape index: {}]   ;;  %s1049_s7 = inlined_call_operand.hbm [shape: f32[16,16], index: 7, kind: output, shape index: {}]  }
   0x1   :  { %14 = vsyncpa [#allocation3 + $0x1], 0  ;;  %s876_s24 = smov 0   ;;  %s878_s25 = smov 0  }
   0x2   :  { %s880_s26 = smov 0   ;;  %s882_s27 = smov 0  }
   0x3 LB: > { %s897_s28 = sadd.s32 4294967295, %s830_s27   ;;  %s613_s29 = sadd.s32 4294967294, %s830_s27   ;;  %s830_s27 = sphi %s882_s27, %s1055_s27   ;;  %s826_s26 = sphi %s880_s26, %s1054_s26   ;;  %s822_s25 = sphi %s878_s25, %s1053_s25   ;;  %s818_s24 = sphi %s876_s24, %s1052_s24  }
   0x4   : > { %s901_s30 = sadd.s32 1, %s830_s27   ;;  %s179_s8 = sadd.s32 1, %s826_s26 }
   0x5   : > { %s176_s9 = ssub.s32 %s830_s27, %s901_s30  ;;  %p189_p0 = scmp.ne.s32.totalorder %s826_s26, %s822_s25 }
   0x6   : > { %p177_p1 = scmp.eq.s32.totalorder %s176_s9, 0  ;;  %p190_p2 = scmp.eq.s32.totalorder %s897_s28, 1 }
   0x7   : > { %p195_p3 = scmp.ne.s32.totalorder %s822_s25, %s818_s24  ;;  %p196_p4 = scmp.eq.s32.totalorder %s613_s29, 1 }
   0x8   : > { %s912_s10 = scalar_select %p177_p1, %s826_s26, %s179_s8  }
   0x9   : > { %p914_p5 = por %p190_p2, %p189_p0  ;;  %p918_p6 = por %p196_p4, %p195_p3 }
   0xa   : > { %p616_p7 = scmp.ge.s32.totalorder %s830_s27, 1  ;;  %p239_p8 = scmp.lt.s32.totalorder %s830_s27, 3 }
   0xc   : > { %p240_p9 = pnand %p616_p7, %p239_p8 }
   0xd   : > { %v275_v0 = vld [vmem:[%s1043_s1] sm:$0xff] (!%p240_p9)  ;;  %v276_v1 = vld [vmem:[%s1043_s1 + $0x8] sm:$0xff] (!%p240_p9)  ;;  %v277_v2 = vld [vmem:[%s1043_s1 + $0x10] sm:$0xff] (!%p240_p9)  ;;  %v832_v3 = vmov (!%p240_p9), 0.0|0.0   ;;  %vm833_vm0 = vmmov (!%p240_p9), 0   ;;  %v834_v6 = vmov (!%p240_p9), 0.0  }
   0xe   : > { %243 = sbr.rel (%p240_p9) target bundleno = 704 (0x2c0), region = 48  ;;  %695 = vmatprep.subr.bf16.mxu0 (!%p240_p9), %v832_v3  ;;  %v696_v4 = vpack.c.bf16 (!%p240_p9), %v276_v1, %v275_v0  ;;  %v278_v5 = vld [vmem:[%s1043_s1 + $0x18] sm:$0xff] (!%p240_p9)  ;;  %658 = vmatprep.mubr.msk.f32.mxu0 (!%p240_p9), %vm833_vm0, %v834_v6  ;;  %p270_p10 = scmp.lt.s32.totalorder (!%p240_p9), %s897_s28, 1  ;;  %v361_v7 = vld [vmem:[%s1045_s3] sm:$0xff] (!%p240_p9)  ;;  %v362_v8 = vld [vmem:[%s1045_s3 + $0x8] sm:$0xff] (!%p240_p9)  ;;  %vm286_vm1 = vcmask (!%p240_p9), 261120  }
   0xf   : > { %701 = vmatprep.subr.bf16.mxu1 (!%p240_p9), %v832_v3  ;;  %v702_v9 = vpack.c.bf16 (!%p240_p9), %v362_v8, %v361_v7  ;;  %677 = vmatprep.mubr.msk.f32.mxu1 (!%p240_p9), %vm833_vm0, %v834_v6  ;;  %v699_v10 = vpack.c.bf16 (!%p240_p9), %v278_v5, %v277_v2  ;;  %v363_v12 = vld [vmem:[%s1045_s3 + $0x10] sm:$0xff] (!%p240_p9)  ;;  %v364_v13 = vld [vmem:[%s1045_s3 + $0x18] sm:$0xff] (!%p240_p9)  ;;  %v365_v15 = vld [vmem:[%s1045_s3 + $0x20] sm:$0xff] (!%p240_p9)  ;;  %vm376_vm2 = vcmask (!%p240_p9), 523264   ;;  %vm464_vm3 = vcmask (!%p240_p9), 392192   ;;  %s267_s16 = sand.u32 (!%p240_p9), 1, %s822_s25  }
  0x10   : > { %697 = vmatpush3.bf16.msra.mxu0 (!%p240_p9), %v696_v4  ;;  %v705_v14 = vpack.c.bf16 (!%p240_p9), %v364_v13, %v363_v12  ;;  %v366_v16 = vld [vmem:[%s1045_s3 + $0x28] sm:$0xff] (!%p240_p9)  ;;  %v367_v18 = vld [vmem:[%s1045_s3 + $0x30] sm:$0xff] (!%p240_p9)  ;;  %v368_v19 = vld [vmem:[%s1045_s3 + $0x38] sm:$0xff] (!%p240_p9)  ;;  %s617_s17 = sshll.u32 (!%p240_p9), %s267_s16, 3  ;;  %s626_s20 = sshll.u32 (!%p240_p9), %s897_s28, 7  ;;  %vm538_vm4 = vcmask (!%p240_p9), 130048  }
  0x11   : > { %698 = vmatprep.subr.bf16.mxu0 (!%p240_p9), %v832_v3  ;;  %703 = vmatpush3.bf16.msra.mxu1 (!%p240_p9), %v702_v9  ;;  %v708_v17 = vpack.c.bf16 (!%p240_p9), %v366_v16, %v365_v15  ;;  %v711_v20 = vpack.c.bf16 (!%p240_p9), %v368_v19, %v367_v18  ;;  %v619_v21 = vld [vmem:[%s1044_s2] ss:$0 sm:$0xff] (!%p240_p9)  ;;  %v452_v27 = vld [vmem:[%s1047_s5 + $0x8] sm:$0xff] (!%p240_p9)  ;;  %v453_v29 = vld [vmem:[%s1047_s5 + $0x10] sm:$0xff] (!%p240_p9)  ;;  %s269_s21 = scalar_lea.vmem (!%p240_p9), [#allocation2], %s617_s17 }
  0x12   : > { %704 = vmatprep.subr.bf16.mxu1 (!%p240_p9), %v832_v3  ;;  %v451_v26 = vld [vmem:[%s1047_s5] sm:$0xff] (!%p240_p9)  ;;  %v454_v30 = vld [vmem:[%s1047_s5 + $0x18] sm:$0xff] (!%p240_p9)  ;;  %v456_v33 = vld [vmem:[%s1047_s5 + $0x28] sm:$0xff] (!%p240_p9)  ;;  %s554_s22 = sshll.u32 (!%p240_p9), %s269_s21, 4  ;;  %s1002_s22 = int_to_ptr.vmem [resolvable:$true] %s554_s22 }
  0x13   : > { %v714_v28 = vpack.c.bf16 (!%p240_p9), %v452_v27, %v451_v26  ;;  %v717_v31 = vpack.c.bf16 (!%p240_p9), %v454_v30, %v453_v29  ;;  %v455_v32 = vld [vmem:[%s1047_s5 + $0x20] sm:$0xff] (!%p240_p9)  ;;  %s768_s13 = scalar_lea.vmem (!%p240_p9), %s1002_s22, 128 }
  0x14   : > { %700 = vmatpush3.bf16.msra.mxu0 (!%p240_p9), %v699_v10  ;;  %v720_v34 = vpack.c.bf16 (!%p240_p9), %v456_v33, %v455_v32  ;;  %v621_v35 = vld [vmem:[%s1046_s4] ss:$0 sm:$0xff] (!%p240_p9)  ;;  %p769_p11 = scmp.ne.s32.totalorder (!%p240_p9), %s1002_s22, %s768_s13 }
  0x15   : > { %s271_s8 = scalar_select %p270_p10, %s897_s28, 1  ;;  %713 = vmatprep.subr.bf16.mxu0 %v832_v3  ;;  %706 = vmatpush3.bf16.msra.mxu1 %v705_v14  ;;  %v623_v40 = vld [vmem:[%s1048_s6] ss:$0 sm:$0xff] }
  0x16   : > { %707 = vmatprep.subr.bf16.mxu1 %v832_v3  ;;  %p770_p12 = pnand %p769_p11, %p914_p5  ;;  %s835_s28 = smov [#allocation2]  }
  0x17   : > { %s618_s9 = sshll.u32 %s271_s8, 3  ;;  %s1000_s8 = scalar_lea.hbm %s1049_s7, %s626_s20 }
  0x18   : > { %s273_s15 = scalar_lea.vmem %s1042_s0, %s618_s9  ;;  %s541_s9 = scalar_lea.sflag [#allocation3], %s267_s16 }
  0x19   : > { %v274_v11 = vld [vmem:[%s273_s15] sm:$0xff]  ;;  %709 = vmatpush3.bf16.msra.mxu1 %v708_v17  ;;  %p771_p13 = pneg %p770_p12  ;;  %s772_s14 = sshll.u32 %s835_s28, 4  ;;  %s773_s14 = int_to_ptr.vmem [resolvable:$false] %s772_s14 }
  0x1a   : > { %659 = vmatmul.mubr.msk.f32.vlgmr.msra.gmra.mrb[0].mxu0 %vm286_vm1, %v274_v11  ;;  %710 = vmatprep.subr.bf16.mxu1 %v832_v3  ;;  %s774_s15 = scalar_lea.vmem %s773_s14, 256  ;;  %p775_p0 = scmp.lt.s32.totalorder %s1002_s22, %s773_s14 }
  0x1b   : > { %692 = vmatprep.mubr.msk.f32.mxu0 %vm833_vm0, %v834_v6  ;;  %715 = vmatpush3.bf16.msra.mxu0 %v714_v28  ;;  %p776_p1 = scmp.lt.s32.totalorder %s774_s15, %s768_s13 }
  0x1c   : > { %716 = vmatprep.subr.bf16.mxu0 %v832_v3 }
  0x1d   : > { %712 = vmatpush3.bf16.msra.mxu1 %v711_v20  ;;  %p777_p2 = por %p776_p1, %p775_p0 }
  0x1f   : > { %718 = vmatpush3.bf16.msra.mxu0 %v717_v31  ;;  %p778_p3 = pnand %p777_p2, %p771_p13 }
  0x20   : > { %719 = vmatprep.subr.bf16.mxu0 %v832_v3 }
  0x23   : > { %721 = vmatpush3.bf16.msra.mxu0 %v720_v34 }
  0xed   : > { %v356_v22 = vpop.f32.mrb[0].mxu0 }
  0xee   : > { %v357_v23 = vadd.f32 %v619_v21, %v356_v22  ;;  %v660_v24 = vpop.f32.mrb[1].mxu0 }
  0xf0   : > { %764 = vtanh.f32 %v357_v23 }
  0xfa   : > { %v765_v25 = vpop.eup %764 }
  0xfb   : > { %678 = vmatmul.mubr.msk.f32.vlgmr.msra.gmra.mrb[0].mxu1 %vm376_vm2, %v765_v25 }
 0x1ce   : > { %v446_v36 = vpop.f32.mrb[0].mxu1 }
 0x1cf   : > { %v447_v37 = vadd.f32 %v621_v35, %v446_v36  ;;  %v679_v38 = vpop.f32.mrb[1].mxu1 }
 0x1d1   : > { %766 = vtanh.f32 %v447_v37 }
 0x1db   : > { %v767_v39 = vpop.eup %766 }
 0x1dc   : > { %693 = vmatmul.mubr.msk.f32.vlgmr.msra.gmra.mrb[2].mxu0 %vm464_vm3, %v767_v39 }
 0x2af   : > { %v534_v41 = vpop.f32.mrb[2].mxu0 }
 0x2b0   : > { %v535_v42 = vadd.f32 %v623_v40, %v534_v41  ;;  %v694_v43 = vpop.f32.mrb[3].mxu0 }
 0x2b2   : > { %539 = vst.msk [vmem:[%s269_s21] sm:$0xff] %vm538_vm4, %v535_v42 }
 0x2b3   : > { %781 = shalt.err (!%p778_p3)
}
 0x2b4   : > { %s782_s16 = scalar_lea.hbm %s1000_s8, 128  ;;  %s786_s19 = scalar_lea.hbm %s1049_s7, 256 }
 0x2b5   : > { %p783_p4 = scmp.ne.s32.totalorder %s1000_s8, %s782_s16  ;;  %p787_p9 = scmp.lt.u32.totalorder %s1000_s8, %s1049_s7 }
 0x2b6   : > { %p788_p10 = scmp.lt.u32.totalorder %s786_s19, %s782_s16  ;;  %p790_p12 = scmp.lt.u32.totalorder %s782_s16, %s1000_s8 }
 0x2b7   : > { %p784_p7 = pnand %p783_p4, %p914_p5 }
 0x2b8   : > { %p789_p11 = por %p788_p10, %p787_p9 }
 0x2b9   : > { %p785_p8 = pneg %p784_p7 }
 0x2ba   : > { %p791_p13 = por %p790_p12, %p789_p11 }
 0x2bc   : > { %p792_p0 = pnand %p791_p13, %p785_p8 }
 0x2be   : > { %795 = shalt.err (!%p792_p0)
}
 0x2bf   : > { %722 = dma.vmem_to_hbm [thread:$0]  (%p914_p5), %s1002_s22, 128, %s1000_s8, %s541_s9  }
 0x2c0 PF: > { %p728_p1 = scmp.ge.s32.totalorder %s830_s27, 2  ;;  %s566_s23 = sand.u32 1, %s818_s24  }
 0x2c1   : > { %s567_s29 = scalar_lea.sflag [#allocation3], %s566_s23 }
 0x2c2   : > { %p725_p2 = pnand %p728_p1, %p918_p6 }
 0x2c4   : > { %813 = dma.done.wait (!%p725_p2), %s567_s29, 128  }
 0x2c5   : > { %815 = vsyncadd (!%p725_p2), %s567_s29, 4294967168  ;;  %p17_p3 = scmp.ge.s32.totalorder %s901_s30, 4   ;;  %s1052_s24 = smov %s822_s25 }
 0x2c6   : > { %s1053_s25 = smov %s826_s26  ;;  %s1054_s26 = smov %s912_s10 }
 0x2c7   : > { %s1055_s27 = smov %s901_s30  ;;  %19 = sbr.rel (!%p17_p3) target bundleno = 3 (0x3), region = 83 }
 0x2ce   :  { %572 = vsyncpa [#allocation3], 1 }
 0x2cf   :  { %574 = vsyncpa [#allocation3 + $0x1], 1 }

// kernel: tpu_custom_call.1
= control target key start
LH: loop header
LB: loop body
LE: loop exit
PB: predicated region body
PF: predicated region fallthrough
CT: control target
= control target key end

     0   :  { %12 = vsyncpa [#allocation3], 0  ;;  %s1042_s0 = inlined_call_operand.vmem [shape: f32[16,32], index: 0, kind: input, shape index: {}]   ;;  %s1043_s1 = inlined_call_operand.vmem [shape: f32[32,64], index: 1, kind: input, shape index: {}]   ;;  %s1044_s2 = inlined_call_operand.vmem [shape: f32[1,64], index: 2, kind: input, shape index: {}]   ;;  %s1045_s3 = inlined_call_operand.vmem [shape: f32[64,48], index: 3, kind: input, shape index: {}]   ;;  %s1046_s4 = inlined_call_operand.vmem [shape: f32[1,48], index: 4, kind: input, shape index: {}]   ;;  %s1047_s5 = inlined_call_operand.vmem [shape: f32[48,16], index: 5, kind: input, shape index: {}]   ;;  %s1048_s6 = inlined_call_operand.vmem [shape: f32[1,16], index: 6, kind: input, shape index: {}]   ;;  %s1049_s7 = inlined_call_operand.hbm [shape: f32[16,16], index: 7, kind: output, shape index: {}]  }
   0x1   :  { %14 = vsyncpa [#allocation3 + $0x1], 0  ;;  %s876_s24 = smov 0   ;;  %s878_s25 = smov 0  }
   0x2   :  { %s880_s26 = smov 0   ;;  %s882_s27 = smov 0  }
   0x3 LB: > { %s897_s28 = sadd.s32 4294967295, %s830_s27   ;;  %s613_s29 = sadd.s32 4294967294, %s830_s27   ;;  %s830_s27 = sphi %s882_s27, %s1055_s27   ;;  %s826_s26 = sphi %s880_s26, %s1054_s26   ;;  %s822_s25 = sphi %s878_s25, %s1053_s25   ;;  %s818_s24 = sphi %s876_s24, %s1052_s24  }
   0x4   : > { %s901_s30 = sadd.s32 1, %s830_s27   ;;  %s179_s8 = sadd.s32 1, %s826_s26 }
   0x5   : > { %s176_s9 = ssub.s32 %s830_s27, %s901_s30  ;;  %p189_p0 = scmp.ne.s32.totalorder %s826_s26, %s822_s25 }
   0x6   : > { %p177_p1 = scmp.eq.s32.totalorder %s176_s9, 0  ;;  %p190_p2 = scmp.eq.s32.totalorder %s897_s28, 1 }
   0x7   : > { %p195_p3 = scmp.ne.s32.totalorder %s822_s25, %s818_s24  ;;  %p196_p4 = scmp.eq.s32.totalorder %s613_s29, 1 }
   0x8   : > { %s912_s10 = scalar_select %p177_p1, %s826_s26, %s179_s8  }
   0x9   : > { %p914_p5 = por %p190_p2, %p189_p0  ;;  %p918_p6 = por %p196_p4, %p195_p3 }
   0xa   : > { %p616_p7 = scmp.ge.s32.totalorder %s830_s27, 1  ;;  %p239_p8 = scmp.lt.s32.totalorder %s830_s27, 3 }
   0xc   : > { %p240_p9 = pnand %p616_p7, %p239_p8 }
   0xd   : > { %v275_v0 = vld [vmem:[%s1043_s1] sm:$0xff] (!%p240_p9)  ;;  %v276_v1 = vld [vmem:[%s1043_s1 + $0x8] sm:$0xff] (!%p240_p9)  ;;  %v277_v2 = vld [vmem:[%s1043_s1 + $0x10] sm:$0xff] (!%p240_p9)  ;;  %v832_v3 = vmov (!%p240_p9), 0.0|0.0   ;;  %vm833_vm0 = vmmov (!%p240_p9), 0   ;;  %v834_v6 = vmov (!%p240_p9), 0.0  }
   0xe   : > { %243 = sbr.rel (%p240_p9) target bundleno = 704 (0x2c0), region = 48  ;;  %695 = vmatprep.subr.bf16.mxu0 (!%p240_p9), %v832_v3  ;;  %v696_v4 = vpack.c.bf16 (!%p240_p9), %v276_v1, %v275_v0  ;;  %v278_v5 = vld [vmem:[%s1043_s1 + $0x18] sm:$0xff] (!%p240_p9)  ;;  %658 = vmatprep.mubr.msk.f32.mxu0 (!%p240_p9), %vm833_vm0, %v834_v6  ;;  %p270_p10 = scmp.lt.s32.totalorder (!%p240_p9), %s897_s28, 1  ;;  %v361_v7 = vld [vmem:[%s1045_s3] sm:$0xff] (!%p240_p9)  ;;  %v362_v8 = vld [vmem:[%s1045_s3 + $0x8] sm:$0xff] (!%p240_p9)  ;;  %vm286_vm1 = vcmask (!%p240_p9), 261120  }
   0xf   : > { %701 = vmatprep.subr.bf16.mxu1 (!%p240_p9), %v832_v3  ;;  %v702_v9 = vpack.c.bf16 (!%p240_p9), %v362_v8, %v361_v7  ;;  %677 = vmatprep.mubr.msk.f32.mxu1 (!%p240_p9), %vm833_vm0, %v834_v6  ;;  %v699_v10 = vpack.c.bf16 (!%p240_p9), %v278_v5, %v277_v2  ;;  %v363_v12 = vld [vmem:[%s1045_s3 + $0x10] sm:$0xff] (!%p240_p9)  ;;  %v364_v13 = vld [vmem:[%s1045_s3 + $0x18] sm:$0xff] (!%p240_p9)  ;;  %v365_v15 = vld [vmem:[%s1045_s3 + $0x20] sm:$0xff] (!%p240_p9)  ;;  %vm376_vm2 = vcmask (!%p240_p9), 523264   ;;  %vm464_vm3 = vcmask (!%p240_p9), 392192   ;;  %s267_s16 = sand.u32 (!%p240_p9), 1, %s822_s25  }
  0x10   : > { %697 = vmatpush3.bf16.msra.mxu0 (!%p240_p9), %v696_v4  ;;  %v705_v14 = vpack.c.bf16 (!%p240_p9), %v364_v13, %v363_v12  ;;  %v366_v16 = vld [vmem:[%s1045_s3 + $0x28] sm:$0xff] (!%p240_p9)  ;;  %v367_v18 = vld [vmem:[%s1045_s3 + $0x30] sm:$0xff] (!%p240_p9)  ;;  %v368_v19 = vld [vmem:[%s1045_s3 + $0x38] sm:$0xff] (!%p240_p9)  ;;  %s617_s17 = sshll.u32 (!%p240_p9), %s267_s16, 3  ;;  %s626_s20 = sshll.u32 (!%p240_p9), %s897_s28, 7  ;;  %vm538_vm4 = vcmask (!%p240_p9), 130048  }
  0x11   : > { %698 = vmatprep.subr.bf16.mxu0 (!%p240_p9), %v832_v3  ;;  %703 = vmatpush3.bf16.msra.mxu1 (!%p240_p9), %v702_v9  ;;  %v708_v17 = vpack.c.bf16 (!%p240_p9), %v366_v16, %v365_v15  ;;  %v711_v20 = vpack.c.bf16 (!%p240_p9), %v368_v19, %v367_v18  ;;  %v619_v21 = vld [vmem:[%s1044_s2] ss:$0 sm:$0xff] (!%p240_p9)  ;;  %v452_v27 = vld [vmem:[%s1047_s5 + $0x8] sm:$0xff] (!%p240_p9)  ;;  %v453_v29 = vld [vmem:[%s1047_s5 + $0x10] sm:$0xff] (!%p240_p9)  ;;  %s269_s21 = scalar_lea.vmem (!%p240_p9), [#allocation2], %s617_s17 }
  0x12   : > { %704 = vmatprep.subr.bf16.mxu1 (!%p240_p9), %v832_v3  ;;  %v451_v26 = vld [vmem:[%s1047_s5] sm:$0xff] (!%p240_p9)  ;;  %v454_v30 = vld [vmem:[%s1047_s5 + $0x18] sm:$0xff] (!%p240_p9)  ;;  %v456_v33 = vld [vmem:[%s1047_s5 + $0x28] sm:$0xff] (!%p240_p9)  ;;  %s554_s22 = sshll.u32 (!%p240_p9), %s269_s21, 4  ;;  %s1002_s22 = int_to_ptr.vmem [resolvable:$true] %s554_s22 }
  0x13   : > { %v714_v28 = vpack.c.bf16 (!%p240_p9), %v452_v27, %v451_v26  ;;  %v717_v31 = vpack.c.bf16 (!%p240_p9), %v454_v30, %v453_v29  ;;  %v455_v32 = vld [vmem:[%s1047_s5 + $0x20] sm:$0xff] (!%p240_p9)  ;;  %s768_s13 = scalar_lea.vmem (!%p240_p9), %s1002_s22, 128 }
  0x14   : > { %700 = vmatpush3.bf16.msra.mxu0 (!%p240_p9), %v699_v10  ;;  %v720_v34 = vpack.c.bf16 (!%p240_p9), %v456_v33, %v455_v32  ;;  %v621_v35 = vld [vmem:[%s1046_s4] ss:$0 sm:$0xff] (!%p240_p9)  ;;  %p769_p11 = scmp.ne.s32.totalorder (!%p240_p9), %s1002_s22, %s768_s13 }
  0x15   : > { %s271_s8 = scalar_select %p270_p10, %s897_s28, 1  ;;  %713 = vmatprep.subr.bf16.mxu0 %v832_v3  ;;  %706 = vmatpush3.bf16.msra.mxu1 %v705_v14  ;;  %v623_v40 = vld [vmem:[%s1048_s6] ss:$0 sm:$0xff] }
  0x16   : > { %707 = vmatprep.subr.bf16.mxu1 %v832_v3  ;;  %p770_p12 = pnand %p769_p11, %p914_p5  ;;  %s835_s28 = smov [#allocation2]  }
  0x17   : > { %s618_s9 = sshll.u32 %s271_s8, 3  ;;  %s1000_s8 = scalar_lea.hbm %s1049_s7, %s626_s20 }
  0x18   : > { %s273_s15 = scalar_lea.vmem %s1042_s0, %s618_s9  ;;  %s541_s9 = scalar_lea.sflag [#allocation3], %s267_s16 }
  0x19   : > { %v274_v11 = vld [vmem:[%s273_s15] sm:$0xff]  ;;  %709 = vmatpush3.bf16.msra.mxu1 %v708_v17  ;;  %p771_p13 = pneg %p770_p12  ;;  %s772_s14 = sshll.u32 %s835_s28, 4  ;;  %s773_s14 = int_to_ptr.vmem [resolvable:$false] %s772_s14 }
  0x1a   : > { %659 = vmatmul.mubr.msk.f32.vlgmr.msra.gmra.mrb[0].mxu0 %vm286_vm1, %v274_v11  ;;  %710 = vmatprep.subr.bf16.mxu1 %v832_v3  ;;  %s774_s15 = scalar_lea.vmem %s773_s14, 256  ;;  %p775_p0 = scmp.lt.s32.totalorder %s1002_s22, %s773_s14 }
  0x1b   : > { %692 = vmatprep.mubr.msk.f32.mxu0 %vm833_vm0, %v834_v6  ;;  %715 = vmatpush3.bf16.msra.mxu0 %v714_v28  ;;  %p776_p1 = scmp.lt.s32.totalorder %s774_s15, %s768_s13 }
  0x1c   : > { %716 = vmatprep.subr.bf16.mxu0 %v832_v3 }
  0x1d   : > { %712 = vmatpush3.bf16.msra.mxu1 %v711_v20  ;;  %p777_p2 = por %p776_p1, %p775_p0 }
  0x1f   : > { %718 = vmatpush3.bf16.msra.mxu0 %v717_v31  ;;  %p778_p3 = pnand %p777_p2, %p771_p13 }
  0x20   : > { %719 = vmatprep.subr.bf16.mxu0 %v832_v3 }
  0x23   : > { %721 = vmatpush3.bf16.msra.mxu0 %v720_v34 }
  0xed   : > { %v356_v22 = vpop.f32.mrb[0].mxu0 }
  0xee   : > { %v357_v23 = vadd.f32 %v619_v21, %v356_v22  ;;  %v660_v24 = vpop.f32.mrb[1].mxu0 }
  0xf0   : > { %764 = vtanh.f32 %v357_v23 }
  0xfa   : > { %v765_v25 = vpop.eup %764 }
  0xfb   : > { %678 = vmatmul.mubr.msk.f32.vlgmr.msra.gmra.mrb[0].mxu1 %vm376_vm2, %v765_v25 }
 0x1ce   : > { %v446_v36 = vpop.f32.mrb[0].mxu1 }
 0x1cf   : > { %v447_v37 = vadd.f32 %v621_v35, %v446_v36  ;;  %v679_v38 = vpop.f32.mrb[1].mxu1 }
 0x1d1   : > { %766 = vtanh.f32 %v447_v37 }
 0x1db   : > { %v767_v39 = vpop.eup %766 }
 0x1dc   : > { %693 = vmatmul.mubr.msk.f32.vlgmr.msra.gmra.mrb[2].mxu0 %vm464_vm3, %v767_v39 }
 0x2af   : > { %v534_v41 = vpop.f32.mrb[2].mxu0 }
 0x2b0   : > { %v535_v42 = vadd.f32 %v623_v40, %v534_v41  ;;  %v694_v43 = vpop.f32.mrb[3].mxu0 }
 0x2b2   : > { %539 = vst.msk [vmem:[%s269_s21] sm:$0xff] %vm538_vm4, %v535_v42 }
 0x2b3   : > { %781 = shalt.err (!%p778_p3)
}
 0x2b4   : > { %s782_s16 = scalar_lea.hbm %s1000_s8, 128  ;;  %s786_s19 = scalar_lea.hbm %s1049_s7, 256 }
 0x2b5   : > { %p783_p4 = scmp.ne.s32.totalorder %s1000_s8, %s782_s16  ;;  %p787_p9 = scmp.lt.u32.totalorder %s1000_s8, %s1049_s7 }
 0x2b6   : > { %p788_p10 = scmp.lt.u32.totalorder %s786_s19, %s782_s16  ;;  %p790_p12 = scmp.lt.u32.totalorder %s782_s16, %s1000_s8 }
 0x2b7   : > { %p784_p7 = pnand %p783_p4, %p914_p5 }
 0x2b8   : > { %p789_p11 = por %p788_p10, %p787_p9 }
 0x2b9   : > { %p785_p8 = pneg %p784_p7 }
 0x2ba   : > { %p791_p13 = por %p790_p12, %p789_p11 }
 0x2bc   : > { %p792_p0 = pnand %p791_p13, %p785_p8 }
 0x2be   : > { %795 = shalt.err (!%p792_p0)
}
 0x2bf   : > { %722 = dma.vmem_to_hbm [thread:$0]  (%p914_p5), %s1002_s22, 128, %s1000_s8, %s541_s9  }
 0x2c0 PF: > { %p728_p1 = scmp.ge.s32.totalorder %s830_s27, 2  ;;  %s566_s23 = sand.u32 1, %s818_s24  }
 0x2c1   : > { %s567_s29 = scalar_lea.sflag [#allocation3], %s566_s23 }
 0x2c2   : > { %p725_p2 = pnand %p728_p1, %p918_p6 }
 0x2c4   : > { %813 = dma.done.wait (!%p725_p2), %s567_s29, 128  }
 0x2c5   : > { %815 = vsyncadd (!%p725_p2), %s567_s29, 4294967168  ;;  %p17_p3 = scmp.ge.s32.totalorder %s901_s30, 4   ;;  %s1052_s24 = smov %s822_s25 }
 0x2c6   : > { %s1053_s25 = smov %s826_s26  ;;  %s1054_s26 = smov %s912_s10 }
 0x2c7   : > { %s1055_s27 = smov %s901_s30  ;;  %19 = sbr.rel (!%p17_p3) target bundleno = 3 (0x3), region = 83 }
 0x2ce   :  { %572 = vsyncpa [#allocation3], 1 }
 0x2cf   :  { %574 = vsyncpa [#allocation3 + $0x1], 1 }

</bundles_post_ra>
